<compile_context>
chip_gen: v7x
topology: tpu7x:2x2x1
jax: 0.10.0
libtpu: 0.0.40
codegen_flags: <defaults>
</compile_context>

<pallas_src>
import functools

import jax
import jax.numpy as jnp
from jax.experimental import pallas as pl
from jax.experimental.pallas import tpu as pltpu


_LARGE_C_THRESHOLD = 32


def _sum_kernel_small_c(x_ref, o_ref):
    # x_ref, o_ref: (C, HO_t, W_t).  Every output channel receives the channel-sum.
    acc_dtype = jnp.float32 if jnp.issubdtype(x_ref.dtype, jnp.floating) else jnp.int32
    s = jnp.sum(x_ref[...], axis=0, dtype=acc_dtype).astype(o_ref.dtype)
    for co in range(o_ref.shape[0]):            # unrolled; C is small on this path
        o_ref[co, :, :] = s


def _sum_kernel_large_c(x_ref, o_ref, s_ref):
    # x_ref: (C, HO_t, W_t); o_ref: (1, HO_t, W_t); s_ref: (HO_t, W_t) VMEM scratch.
    # The input block index ignores the innermost co grid axis, so the (C, HO_t, W_t)
    # block is DMA'd once per (b, ho, w) tile; the sum is computed once and the single
    # slab is re-stored for every output channel.
    @pl.when(pl.program_id(3) == 0)
    def _():
        acc = jnp.float32 if jnp.issubdtype(x_ref.dtype, jnp.floating) else jnp.int32
        s_ref[...] = jnp.sum(x_ref[...], axis=0, dtype=acc).astype(s_ref.dtype)

    o_ref[0, :, :] = s_ref[...].astype(o_ref.dtype)


def _vmem_budget_bytes():
    """(per-step live-block budget, vmem_limit_bytes), generation aware.

    Default is safe for every generation including v7x (64 MiB physical VMEM per TC);
    bump only when the hardware query confirms a 128 MiB part (v5e/v6e)."""
    budget, limit = 24 * 1024 * 1024, 48 * 1024 * 1024
    try:
        cap = int(pltpu.get_tpu_info().vmem_capacity_bytes)
        if cap > 64 * 1024 * 1024:
            budget, limit = 32 * 1024 * 1024, 64 * 1024 * 1024
    except Exception:
        pass
    return budget, limit


def _choose_tiles(h_out, w, itemsize, per_w_elem_bytes, budget):
    """Pick (ho_t, w_t).

    per_w_elem_bytes = live (double-buffered in+out+scratch) bytes per (ho=1, w=1)
    element of the block.  Prefers w_t == W (longest contiguous DMA segments) and
    trades ho_t down to stay inside `budget`, rounding DOWN to a dtype-aware sublane
    multiple (never exceeds the budget)."""
    sub_align = 8 * max(1, 4 // itemsize)       # 8 f32, 16 bf16/f16, 32 int8/fp8

    candidates = [w]                            # full width is always a legal lane block here
    if w % 128 == 0:
        candidates += [t for t in range(w - 128, 0, -128) if w % t == 0]

    for w_t in candidates:
        per_row = per_w_elem_bytes * w_t
        ho_max = budget // max(per_row, 1)
        if ho_max < 1:
            continue                            # even one row too big: narrow the lane tile
        if ho_max >= h_out:
            return h_out, w_t                   # full H_out fits (full-dim block, always legal)
        align = sub_align if ho_max >= sub_align else 8
        if ho_max >= align:
            return (ho_max // align) * align, w_t   # round DOWN: never blows the budget
        # Can't keep sublane alignment at this width; try a narrower lane tile instead.
    # Extreme fallback (absurdly large C): smallest reasonable aligned block.
    return min(h_out, 8), candidates[-1]


@functools.partial(jax.jit, static_argnums=(1,))
def octave_split(x, floor):
    """Equivalent of OctaveSplit(floor, channels)(x) for NCHW input."""
    n, c, h, w = x.shape
    if not 0 <= floor < 12:
        raise ValueError(f"floor must be in [0, 12), got {floor}")
    if h < 12:
        raise ValueError(f"need H >= 12, got {h}")
    h_out = (h - 12) // 12 + 1                  # conv output height (kernel=stride=12)
    itemsize = x.dtype.itemsize

    use_view = (h == 12 * h_out) and (w % 128 == 0)
    if use_view:
        # Free contiguous view: x_in[n,c,ho, k*w + j] == x[n,c,12*ho + k, j]; selecting
        # k == floor becomes an aligned lane-block offset in the input BlockSpec.
        x_in = x.reshape(n, c, h_out, 12 * w)
    else:
        # Remainder / unaligned-W path: strided row selection in the wrapper.  This
        # touches only ~1/12 of the input (exactly the rows the conv reads), not a
        # full-tensor copy.
        # TODO(synk): could be made fully copy-free with a manual pl.ANY +
        # make_async_copy row gather; the win is small since only 1/12 is touched.
        x_in = x[:, :, floor:floor + 12 * h_out:12, :]

    large_c = c >= _LARGE_C_THRESHOLD
    budget, vmem_limit = _vmem_budget_bytes()
    # Live bytes per (ho=1, w=1) element of the block set (double-buffered).
    per_w_elem = ((2 * c + 3) if large_c else (4 * c)) * itemsize
    ho_t, w_t = _choose_tiles(h_out, w, itemsize, per_w_elem, budget)

    # v7x has 2 TensorCores: make sure the parallel grid has >= 2 steps when possible
    # (harmless on single-TC v5e/v6e: only triggers on problems that fit one block).
    if n == 1 and pl.cdiv(h_out, ho_t) == 1 and (w // w_t) == 1:
        if w_t % 256 == 0:
            w_t //= 2
        elif ho_t >= 16 and (ho_t // 2) % 8 == 0:
            ho_t //= 2

    # Lane-offset trick validity: the block-index arithmetic silently selects the
    # wrong rows if w_t ever stops dividing W, so assert it statically.
    assert w % w_t == 0, (w, w_t)
    if use_view:
        assert w_t % 128 == 0, (w, w_t)
    lane_off = floor * (w // w_t) if use_view else 0

    grid_par = (n, pl.cdiv(h_out, ho_t), w // w_t)
    out_shape = jax.ShapeDtypeStruct((n, c, h_out, w), x.dtype)
    cost = pl.CostEstimate(
        flops=int(n) * max(c - 1, 0) * int(h_out) * int(w),
        transcendentals=0,
        bytes_accessed=2 * int(n) * int(c) * int(h_out) * int(w) * itemsize,
    )

    if large_c:
        # Innermost "arbitrary" per-output-channel axis: output VMEM does not scale
        # with C, and the input block (index_map ignores co) is not re-DMA'd.
        grid = grid_par + (c,)
        in_spec = pl.BlockSpec(
            (None, c, ho_t, w_t),
            lambda b, hi, wi, co: (b, 0, hi, lane_off + wi),
        )
        out_spec = pl.BlockSpec(
            (None, 1, ho_t, w_t),
            lambda b, hi, wi, co: (b, co, hi, wi),
        )
        return pl.pallas_call(
            _sum_kernel_large_c,
            out_shape=out_shape,
            grid=grid,
            in_specs=[in_spec],
            out_specs=out_spec,
            scratch_shapes=[pltpu.VMEM((ho_t, w_t), x.dtype)],
            compiler_params=pltpu.CompilerParams(
                dimension_semantics=("parallel", "parallel", "parallel", "arbitrary"),
                vmem_limit_bytes=vmem_limit,
            ),
            cost_estimate=cost,
        )(x_in)

    in_spec = pl.BlockSpec(
        (None, c, ho_t, w_t),
        lambda b, hi, wi: (b, 0, hi, lane_off + wi),
    )
    out_spec = pl.BlockSpec(
        (None, c, ho_t, w_t),
        lambda b, hi, wi: (b, 0, hi, wi),
    )
    return pl.pallas_call(
        _sum_kernel_small_c,
        out_shape=out_shape,
        grid=grid_par,
        in_specs=[in_spec],
        out_specs=out_spec,
        compiler_params=pltpu.CompilerParams(
            dimension_semantics=("parallel", "parallel", "parallel"),
            vmem_limit_bytes=vmem_limit,
        ),
        cost_estimate=cost,
    )(x_in)


def _reference(x, floor):
    # Pure-JAX reference of the conv-with-one-hot-weight forward.
    n, c, h, w = x.shape
    h_out = (h - 12) // 12 + 1
    rows = floor + 12 * jnp.arange(h_out)
    sel = x[:, :, rows, :]                      # (N, C, H_out, W)
    s = jnp.sum(sel, axis=1, keepdims=True)     # (N, 1, H_out, W)
    return jnp.broadcast_to(s, (n, c, h_out, w))


if __name__ == "__main__":
    key = jax.random.PRNGKey(0)

    # Case 1: aligned view path (H % 12 == 0, W % 128 == 0), small C.
    N, C, H, W = 2, 4, 24, 128
    FLOOR = 5
    x = jax.random.normal(key, (N, C, H, W), dtype=jnp.float32)
    out = jax.block_until_ready(octave_split(x, FLOOR))
    ref = _reference(x, FLOOR)
    assert out.shape == (N, C, H // 12, W), out.shape
    assert out.dtype == x.dtype
    assert jnp.allclose(out, ref, atol=1e-5, rtol=1e-5)

    # Case 2: remainder path (H % 12 != 0 -> trailing rows dropped), floor at edge.
    x2 = jax.random.normal(jax.random.PRNGKey(1), (1, 3, 37, 256), dtype=jnp.float32)
    out2 = jax.block_until_ready(octave_split(x2, 0))
    ref2 = _reference(x2, 0)
    assert out2.shape == (1, 3, 3, 256), out2.shape
    assert jnp.allclose(out2, ref2, atol=1e-5, rtol=1e-5)

    # Case 3: large-C path (per-output-channel grid axis + VMEM scratch slab).
    x3 = jax.random.normal(jax.random.PRNGKey(2), (1, 32, 24, 128), dtype=jnp.float32)
    out3 = jax.block_until_ready(octave_split(x3, 7))
    ref3 = _reference(x3, 7)
    assert out3.shape == (1, 32, 2, 128), out3.shape
    assert jnp.allclose(out3, ref3, atol=1e-4, rtol=1e-5)

    print("KERNEL_OK")
</pallas_src>

<mosaic_0001>
module attributes {stable_mosaic.version = 11 : i64} {
  func.func @_sum_kernel_small_c(%arg0: i32, %arg1: i32, %arg2: i32, %arg3: memref<1x4x2x128xf32, #tpu.memory_space<vmem>>, %arg4: memref<1x4x2x128xf32, #tpu.memory_space<vmem>>) attributes {dimension_semantics = [#tpu.dimension_semantics<parallel>, #tpu.dimension_semantics<parallel>, #tpu.dimension_semantics<parallel>], iteration_bounds = array<i64: 2, 1, 1>, scalar_prefetch = 0 : i64, scratch_operands = 0 : i64, tpu.core_type = #tpu.core_type<tc>, window_params = [{transform_indices = @transform_0, window_bounds = array<i64: 1, 4, 2, 128>}, {transform_indices = @transform_1, window_bounds = array<i64: 1, 4, 2, 128>}]} {
    %c0 = arith.constant 0 : index
    %c0_0 = arith.constant 0 : index
    %c0_1 = arith.constant 0 : index
    %c0_2 = arith.constant 0 : index
    %0 = vector.load %arg3[%c0, %c0_0, %c0_1, %c0_2] : memref<1x4x2x128xf32, #tpu.memory_space<vmem>>, vector<1x4x2x128xf32>
    %1 = vector.shape_cast %0 : vector<1x4x2x128xf32> to vector<4x2x128xf32>
    %cst = arith.constant dense<0.000000e+00> : vector<2x128xf32>
    %2 = vector.multi_reduction <add>, %1, %cst [0] : vector<4x2x128xf32> to vector<2x128xf32>
    %c0_3 = arith.constant 0 : index
    %c0_4 = arith.constant 0 : index
    %c0_5 = arith.constant 0 : index
    %c0_6 = arith.constant 0 : index
    %3 = vector.load %arg4[%c0_3, %c0_4, %c0_5, %c0_6] : memref<1x4x2x128xf32, #tpu.memory_space<vmem>>, vector<1x1x2x128xf32>
    %4 = vector.shape_cast %3 : vector<1x1x2x128xf32> to vector<2x128xf32>
    %5 = vector.shape_cast %2 : vector<2x128xf32> to vector<1x1x2x128xf32>
    tpu.vector_store %arg4[%c0_3, %c0_4, %c0_5, %c0_6], %5 {strides = array<i32>} : memref<1x4x2x128xf32, #tpu.memory_space<vmem>>, vector<1x1x2x128xf32>,
    %c0_7 = arith.constant 0 : index
    %c1 = arith.constant 1 : index
    %c0_8 = arith.constant 0 : index
    %c0_9 = arith.constant 0 : index
    %6 = vector.load %arg4[%c0_7, %c1, %c0_8, %c0_9] : memref<1x4x2x128xf32, #tpu.memory_space<vmem>>, vector<1x1x2x128xf32>
    %7 = vector.shape_cast %6 : vector<1x1x2x128xf32> to vector<2x128xf32>
    %8 = vector.shape_cast %2 : vector<2x128xf32> to vector<1x1x2x128xf32>
    tpu.vector_store %arg4[%c0_7, %c1, %c0_8, %c0_9], %8 {strides = array<i32>} : memref<1x4x2x128xf32, #tpu.memory_space<vmem>>, vector<1x1x2x128xf32>,
    %c0_10 = arith.constant 0 : index
    %c2 = arith.constant 2 : index
    %c0_11 = arith.constant 0 : index
    %c0_12 = arith.constant 0 : index
    %9 = vector.load %arg4[%c0_10, %c2, %c0_11, %c0_12] : memref<1x4x2x128xf32, #tpu.memory_space<vmem>>, vector<1x1x2x128xf32>
    %10 = vector.shape_cast %9 : vector<1x1x2x128xf32> to vector<2x128xf32>
    %11 = vector.shape_cast %2 : vector<2x128xf32> to vector<1x1x2x128xf32>
    tpu.vector_store %arg4[%c0_10, %c2, %c0_11, %c0_12], %11 {strides = array<i32>} : memref<1x4x2x128xf32, #tpu.memory_space<vmem>>, vector<1x1x2x128xf32>,
    %c0_13 = arith.constant 0 : index
    %c3 = arith.constant 3 : index
    %c0_14 = arith.constant 0 : index
    %c0_15 = arith.constant 0 : index
    %12 = vector.load %arg4[%c0_13, %c3, %c0_14, %c0_15] : memref<1x4x2x128xf32, #tpu.memory_space<vmem>>, vector<1x1x2x128xf32>
    %13 = vector.shape_cast %12 : vector<1x1x2x128xf32> to vector<2x128xf32>
    %14 = vector.shape_cast %2 : vector<2x128xf32> to vector<1x1x2x128xf32>
    tpu.vector_store %arg4[%c0_13, %c3, %c0_14, %c0_15], %14 {strides = array<i32>} : memref<1x4x2x128xf32, #tpu.memory_space<vmem>>, vector<1x1x2x128xf32>,
    return
  }
  func.func @transform_0(%arg0: i32, %arg1: i32, %arg2: i32) -> (i32, i32, i32, i32) {
    %c5_i32 = arith.constant 5 : i32
    %0 = arith.addi %c5_i32, %arg2 : i32
    %c0_i32 = arith.constant 0 : i32
    %c0_i32_0 = arith.constant 0 : i32
    return %arg0, %c0_i32, %arg1, %0 : i32, i32, i32, i32
  }
  func.func @transform_1(%arg0: i32, %arg1: i32, %arg2: i32) -> (i32, i32, i32, i32) {
    %c0_i32 = arith.constant 0 : i32
    %c0_i32_0 = arith.constant 0 : i32
    return %arg0, %c0_i32, %arg1, %arg2 : i32, i32, i32, i32
  }
}

</mosaic_0001>

<bundles_post_ra>
// kernel: octave_split.1
= control target key start
LH: loop header
LB: loop body
LE: loop exit
PB: predicated region body
PF: predicated region fallthrough
CT: control target
= control target key end

     0   :  { %6 = vsyncpa [#allocation4], 0  ;;  %s617_s0 = inlined_call_operand.vmem [shape: f32[2,4,2,1536], index: 0, kind: input, shape index: {}]   ;;  %s618_s1 = inlined_call_operand.hbm [shape: f32[2,4,2,128], index: 1, kind: output, shape index: {}]  }
   0x1   :  { %8 = vsyncpa [#allocation4 + $0x1], 0  ;;  %s497_s6 = smov 0   ;;  %s499_s7 = smov 0  }
   0x2   :  { %s501_s8 = smov 0   ;;  %s503_s9 = smov 0  }
   0x3   :  { %s505_s10 = smov 0   ;;  %s507_s11 = smov 0  }
   0x4 LB: > { %s325_s12 = sadd.s32 4294967295, %s482_s11   ;;  %s326_s13 = sadd.s32 4294967294, %s482_s11   ;;  %s482_s11 = sphi %s507_s11, %s14_s11   ;;  %s478_s10 = sphi %s505_s10, %s625_s10   ;;  %s474_s9 = sphi %s503_s9, %s624_s9   ;;  %s470_s8 = sphi %s501_s8, %s623_s8   ;;  %s466_s7 = sphi %s499_s7, %s622_s7   ;;  %s462_s6 = sphi %s497_s6, %s621_s6  }
   0x5   : > { %s33_s14 = sadd.s32 1, %s478_s10  ;;  %s46_s15 = sadd.s32 1, %s470_s8 }
   0x6   : > { %p35_p0 = scmp.ge.s32.totalorder %s33_s14, 2  ;;  %p53_p1 = scmp.ne.s32.totalorder %s470_s8, %s466_s7 }
   0x7   : > { %p54_p2 = scmp.eq.s32.totalorder %s482_s11, 0  ;;  %p87_p3 = scmp.eq.s32.totalorder %s325_s12, 1 }
   0x8   : > { %s627_s14 = smov (%p35_p0, %s33_s14), 0  ;;  %p92_p6 = scmp.ne.s32.totalorder %s466_s7, %s462_s6 }
   0x9   : > { %p55_p4 = por %p54_p2, %p53_p1  ;;  %p536_p5 = por %p87_p3, %p53_p1 }
   0xa   : > { %s39_s17 = ssub.s32 %s478_s10, %s627_s14  ;;  %p93_p8 = scmp.eq.s32.totalorder %s326_s13, 1 }
   0xb   : > { %p44_p7 = scmp.eq.s32.totalorder %s39_s17, 0  ;;  %p328_p10 = scmp.ge.s32.totalorder %s482_s11, 2 }
   0xc   : > { %p547_p9 = por %p93_p8, %p92_p6 }
   0xd   : > { %s545_s18 = scalar_select %p44_p7, %s470_s8, %s46_s15  }
   0xe   : > { %109 = sbr.rel (%p328_p10) target bundleno = 28 (0x1c), region = 16 }
  0x15   : > { %112 = sbr.rel (!%p55_p4) target bundleno = 28 (0x1c), region = 20  ;;  %s114_s20 = sand.u32 (%p55_p4), 1, %s470_s8  }
  0x16   : > { %s330_s21 = smul.u32 (%p55_p4), 96, %s478_s10  ;;  %s329_s22 = sshll.u32 (%p55_p4), %s114_s20, 3 }
  0x17   : > { %s116_s26 = scalar_lea.vmem (%p55_p4), [#allocation2], %s329_s22 }
  0x18   : > { %s269_s25 = scalar_lea.vmem (%p55_p4), %s617_s0, %s330_s21 }
  0x19   : > { %v331_v0 = vld [vmem:[%s269_s25 + $0xa] sm:$0x3] (%p55_p4)  ;;  %v332_v1 = vld [vmem:[%s269_s25 + $0x22] sm:$0x3] (%p55_p4)  ;;  %v333_v2 = vld [vmem:[%s269_s25 + $0x3a] sm:$0x3] (%p55_p4) }
  0x1a   : > { %140 = vst [vmem:[%s116_s26] sm:$0x3] (%p55_p4), %v331_v0  ;;  %142 = vst [vmem:[%s116_s26 + $0x2] sm:$0x3] (%p55_p4), %v332_v1  ;;  %v334_v3 = vld [vmem:[%s269_s25 + $0x52] sm:$0x3] (%p55_p4) }
  0x1b   : > { %144 = vst [vmem:[%s116_s26 + $0x4] sm:$0x3] (%p55_p4), %v333_v2  ;;  %146 = vst [vmem:[%s116_s26 + $0x6] sm:$0x3] (%p55_p4), %v334_v3 }
  0x1c PF: > { %p335_p11 = scmp.ge.s32.totalorder %s482_s11, 1  ;;  %p176_p12 = scmp.lt.s32.totalorder %s482_s11, 3 }
  0x1e   : > { %p177_p13 = pnand %p335_p11, %p176_p12 }
  0x1f   : > { %s183_s27 = sand.u32 (!%p177_p13), 1, %s466_s7   ;;  %vm207_vm0 = vcmask (!%p177_p13), 1041408   ;;  %s346_s3 = sshll.u32 (!%p177_p13), %s474_s9, 7 }
  0x20   : > { %180 = sbr.rel (%p177_p13) target bundleno = 60 (0x3c), region = 61  ;;  %s336_s28 = sshll.u32 (!%p177_p13), %s183_s27, 3 }
  0x21   : > { %s185_s29 = scalar_lea.vmem (!%p177_p13), [#allocation2], %s336_s28  ;;  %s201_s30 = scalar_lea.vmem (!%p177_p13), [#allocation3], %s336_s28 }
  0x22   : > { %v203_v4 = vld [vmem:[%s185_s29] sm:$0x3] (!%p177_p13)  ;;  %v204_v5 = vld [vmem:[%s185_s29 + $0x2] sm:$0x3] (!%p177_p13)  ;;  %v205_v6 = vld [vmem:[%s185_s29 + $0x4] sm:$0x3] (!%p177_p13)  ;;  %s568_s12 = scalar_lea.hbm (!%p177_p13), %s618_s1, %s346_s3 }
  0x23   : > { %v206_v7 = vld [vmem:[%s185_s29 + $0x6] sm:$0x3] (!%p177_p13)  ;;  %v208_v8 = vsel (!%p177_p13), %vm207_vm0, %v203_v4, 0.0  ;;  %v209_v9 = vsel (!%p177_p13), %vm207_vm0, %v204_v5, 0.0  ;;  %v211_v10 = vsel (!%p177_p13), %vm207_vm0, %v205_v6, 0.0  ;;  %s238_s2 = sshll.u32 (!%p177_p13), %s201_s30, 4  ;;  %s563_s2 = int_to_ptr.vmem [resolvable:$true] %s238_s2 }
  0x24   : > { %v210_v11 = vadd.f32 (!%p177_p13), %v209_v9, %v208_v8  ;;  %v213_v12 = vsel (!%p177_p13), %vm207_vm0, %v206_v7, 0.0  ;;  %s570_s13 = scalar_lea.sflag (!%p177_p13), [#allocation4], %s183_s27  ;;  %s404_s9 = scalar_lea.vmem (!%p177_p13), %s563_s2, 128 }
  0x25   : > { %p405_p0 = scmp.ne.s32.totalorder (!%p177_p13), %s563_s2, %s404_s9  ;;  %s484_s15 = smov (!%p177_p13), [#allocation3]  }
  0x26   : > { %v212_v13 = vadd.f32 (!%p177_p13), %v211_v10, %v210_v11  ;;  %s408_s17 = sshll.u32 (!%p177_p13), %s484_s15, 4  ;;  %s409_s17 = int_to_ptr.vmem [resolvable:$false] %s408_s17 }
  0x27   : > { %p406_p1 = pnand %p405_p0, %p536_p5  ;;  %s410_s20 = scalar_lea.vmem %s409_s17, 256 }
  0x28   : > { %v214_v14 = vadd.f32 %v213_v12, %v212_v13  ;;  %p411_p3 = scmp.lt.s32.totalorder %s563_s2, %s409_s17  ;;  %p412_p4 = scmp.lt.s32.totalorder %s410_s20, %s404_s9 }
  0x29   : > { %p407_p2 = pneg %p406_p1 }
  0x2a   : > { %215 = vst [vmem:[%s201_s30] sm:$0x3] %v214_v14  ;;  %338 = vst [vmem:[%s201_s30 + $0x2] sm:$0x3] %v214_v14  ;;  %p413_p6 = por %p412_p4, %p411_p3 }
  0x2b   : > { %339 = vst [vmem:[%s201_s30 + $0x4] sm:$0x3] %v214_v14  ;;  %340 = vst [vmem:[%s201_s30 + $0x6] sm:$0x3] %v214_v14 }
  0x2c   : > { %p414_p7 = pnand %p413_p6, %p407_p2 }
  0x2e   : > { %417 = shalt.err (!%p414_p7)
}
  0x2f   : > { %s418_s21 = scalar_lea.hbm %s568_s12, 128  ;;  %s422_s24 = scalar_lea.hbm %s618_s1, 256 }
  0x30   : > { %p419_p8 = scmp.ne.s32.totalorder %s568_s12, %s418_s21  ;;  %p423_p13 = scmp.lt.u32.totalorder %s568_s12, %s618_s1 }
  0x31   : > { %p424_p0 = scmp.lt.u32.totalorder %s422_s24, %s418_s21  ;;  %p426_p2 = scmp.lt.u32.totalorder %s418_s21, %s568_s12 }
  0x32   : > { %p420_p11 = pnand %p419_p8, %p536_p5 }
  0x33   : > { %p425_p1 = por %p424_p0, %p423_p13 }
  0x34   : > { %p421_p12 = pneg %p420_p11 }
  0x35   : > { %p427_p3 = por %p426_p2, %p425_p1 }
  0x37   : > { %p428_p4 = pnand %p427_p3, %p421_p12 }
  0x39   : > { %431 = shalt.err (!%p428_p4)
}
  0x3a   : > { %s485_s27 = smov 32   ;;  %s486_s28 = smov 2  }
  0x3b   : > { %347 = dma.vmem_to_hbm [thread:$0]  (%p536_p5), %s563_s2, 128, %s568_s12, %s570_s13, %s485_s27, %s485_s27, %s486_s28  }
  0x3c PF: > { %s253_s29 = sand.u32 1, %s462_s6   ;;  %p350_p6 = pnand %p328_p10, %p547_p9 }
  0x3d   : > { %s254_s30 = scalar_lea.sflag [#allocation4], %s253_s29 }
  0x3e   : > { %457 = dma.done.wait (!%p350_p6), %s254_s30, 128  }
  0x3f   : > { %459 = vsyncadd (!%p350_p6), %s254_s30, 4294967168  ;;  %s14_s11 = sadd.s32 1, %s482_s11   ;;  %s621_s6 = smov %s466_s7 }
  0x40   : > { %p11_p7 = scmp.ge.s32.totalorder %s14_s11, 4   ;;  %s622_s7 = smov %s470_s8 }
  0x41   : > { %s623_s8 = smov %s545_s18  ;;  %s624_s9 = smov %s478_s10 }
  0x42   : > { %s625_s10 = smov %s627_s14  ;;  %13 = sbr.rel (!%p11_p7) target bundleno = 4 (0x4), region = 108 }
  0x49   :  { %259 = vsyncpa [#allocation4], 1 }
  0x4a   :  { %261 = vsyncpa [#allocation4 + $0x1], 1 }

</bundles_post_ra>
